<compile_context>
chip_gen: v5e
topology: v5e:2x2
jax: 0.10.0
libtpu: 0.0.40
codegen_flags: <defaults>
</compile_context>

<pallas_src>
import functools
from typing import NamedTuple

import jax
import jax.numpy as jnp
from jax import lax
from jax.experimental import pallas as pl
from jax.experimental.pallas import tpu as pltpu

_LANE = 128
# Conservative per-step, double-buffered VMEM budget: fits the default scoped
# limits on v5e (16 MiB), v6e/v7x (32 MiB) with headroom.
_VMEM_BUDGET = 14 * 1024 * 1024


def _cdiv(a, b):
    return (a + b - 1) // b


def _round_up(v, m):
    return ((v + m - 1) // m) * m


# ---------------------------------------------------------------------------
# Kernels
# ---------------------------------------------------------------------------
def _linear_kernel(x_ref, w_ref, b_ref, o_ref):
    """Single-K-block tile: o = x @ W + b. W is already (K, N); bias is f32."""
    acc = lax.dot_general(
        x_ref[...], w_ref[...],
        dimension_numbers=(((1,), (0,)), ((), ())),
        preferred_element_type=jnp.float32)
    o_ref[...] = (acc + b_ref[...]).astype(o_ref.dtype)


def _linear_kernel_acc(x_ref, w_ref, b_ref, o_ref, acc_ref):
    """Multi-K-block tile with f32 accumulator; bias folded into the init."""

    @pl.when(pl.program_id(3) == 0)
    def _():
        acc_ref[...] = jnp.broadcast_to(b_ref[...], acc_ref.shape)

    acc_ref[...] += lax.dot_general(
        x_ref[...], w_ref[...],
        dimension_numbers=(((1,), (0,)), ((), ())),
        preferred_element_type=jnp.float32)

    @pl.when(pl.program_id(3) == pl.num_programs(3) - 1)
    def _():
        o_ref[...] = acc_ref[...].astype(o_ref.dtype)


# ---------------------------------------------------------------------------
# Tiling
# ---------------------------------------------------------------------------
def _pick_tiles(m, np_, kp, cbytes, obytes, tm_req, tn_req, tk_req):
    """Balanced M/N tiles + K tile (collapsed whenever it fits VMEM)."""
    row_align = 16 if cbytes < 4 else 8
    tm = min(tm_req, _round_up(_cdiv(m, _cdiv(m, tm_req)), row_align))
    tn = min(tn_req, _round_up(_cdiv(np_, _cdiv(np_, tn_req)), _LANE))
    out_dbuf = 2 * tm * tn * obytes

    def footprint(tk):
        acc = 0 if tk == kp else tm * tn * 4
        bias = 2 * tn * 4
        return out_dbuf + 2 * (tm + tn) * tk * cbytes + acc + bias

    if tk_req is not None:
        cands = [kp] + [c for c in (2048, 1024, 512, 256, 128) if c < kp]
        fitting = [c for c in cands if kp % c == 0 and c <= max(tk_req, 128)]
        tk = max(fitting) if fitting else 128
    elif footprint(kp) <= _VMEM_BUDGET:
        tk = kp
    else:
        tk = 128
        for cand in (2048, 1024, 512, 256):
            if kp % cand == 0 and footprint(cand) <= _VMEM_BUDGET:
                tk = cand
                break
    return tm, tn, tk, footprint(tk)


# ---------------------------------------------------------------------------
# Fused pallas_call (both partitions, one kernel launch)
# ---------------------------------------------------------------------------
def _fused_pallas_call(x_arr, w, b, *, shared_x, m, out_dtype,
                       tm_req, tn_req, tk_req):
    kp, np_ = w.shape[1], w.shape[2]
    cbytes = jnp.dtype(w.dtype).itemsize
    obytes = jnp.dtype(out_dtype).itemsize
    tm, tn, tk, est = _pick_tiles(m, np_, kp, cbytes, obytes,
                                  tm_req, tn_req, tk_req)
    gm, gn, gk = _cdiv(m, tm), _cdiv(np_, tn), kp // tk
    single_k = (gk == 1)

    if single_k:
        w_idx = lambda p, i, j: (p, 0, j)
        b_idx = lambda p, i, j: (p, 0, j)
        o_idx = lambda p, i, j: (p, i, j)
        if shared_x:   # x: (m, 2*kp); partition p reads K columns [p*kp, (p+1)*kp)
            x_spec = pl.BlockSpec((tm, tk), lambda p, i, j: (i, p))
        else:          # x: (2, m, kp)
            x_spec = pl.BlockSpec((None, tm, tk), lambda p, i, j: (p, i, 0))
        grid = (2, gm, gn)
        kernel = _linear_kernel
        scratch = ()
        semantics = ("parallel", "parallel", "parallel")
    else:
        w_idx = lambda p, i, j, k: (p, k, j)
        b_idx = lambda p, i, j, k: (p, 0, j)
        o_idx = lambda p, i, j, k: (p, i, j)
        if shared_x:
            x_spec = pl.BlockSpec((tm, tk), lambda p, i, j, k: (i, p * gk + k))
        else:
            x_spec = pl.BlockSpec((None, tm, tk), lambda p, i, j, k: (p, i, k))
        grid = (2, gm, gn, gk)
        kernel = _linear_kernel_acc
        scratch = (pltpu.VMEM((tm, tn), jnp.float32),)
        semantics = ("parallel", "parallel", "parallel", "arbitrary")

    vmem_limit = int(min(max(2 * est, 32 * 1024 * 1024), 48 * 1024 * 1024))

    return pl.pallas_call(
        kernel,
        out_shape=jax.ShapeDtypeStruct((2, m, np_), out_dtype),
        grid_spec=pltpu.PrefetchScalarGridSpec(
            num_scalar_prefetch=0,
            grid=grid,
            in_specs=[
                x_spec,
                pl.BlockSpec((None, tk, tn), w_idx),   # W in (K, N) layout
                pl.BlockSpec((None, 1, tn), b_idx),    # bias, float32
            ],
            out_specs=pl.BlockSpec((None, tm, tn), o_idx),
            scratch_shapes=scratch,
        ),
        compiler_params=pltpu.CompilerParams(
            dimension_semantics=semantics,
            vmem_limit_bytes=vmem_limit),
    )(x_arr, w, b)


# ---------------------------------------------------------------------------
# Parameter prep (one-time, outside the per-call jit)
# ---------------------------------------------------------------------------
class PartitionedLinearParams(NamedTuple):
    w: jax.Array       # (2, kp, np_), compute dtype, (K, N) layout
    b: jax.Array       # (2, 1, np_), float32
    n_half: int
    k_half: int


def prepare_partitioned_linear_params(w_c, b_c, w_p, b_p,
                                      compute_dtype=jnp.bfloat16):
    """Pre-transpose to (K, N), zero-pad to lane multiples, cast, and stack."""
    n_half, k_half = w_c.shape
    if w_p.shape != (n_half, k_half):
        raise ValueError("linear_c / linear_p weights must have equal shapes.")
    kp = _round_up(k_half, _LANE)
    np_ = _round_up(n_half, _LANE)

    def prep_w(w):
        wt = jnp.asarray(w).T.astype(compute_dtype)           # (k_half, n_half)
        return jnp.pad(wt, ((0, kp - k_half), (0, np_ - n_half)))

    def prep_b(b):
        b = jnp.asarray(b, jnp.float32).reshape(1, n_half)    # keep bias in f32
        return jnp.pad(b, ((0, 0), (0, np_ - n_half)))

    w = jnp.stack([prep_w(w_c), prep_w(w_p)])                 # (2, kp, np_)
    b = jnp.stack([prep_b(b_c), prep_b(b_p)])                 # (2, 1, np_)
    return PartitionedLinearParams(w=w, b=b, n_half=int(n_half),
                                   k_half=int(k_half))


# ---------------------------------------------------------------------------
# Forward
# ---------------------------------------------------------------------------
@functools.partial(jax.jit,
                   static_argnames=("n_half", "k_half", "tm", "tn", "tk"))
def _forward_full(x2d, w, b, *, n_half, k_half, tm, tn, tk):
    out_dtype = x2d.dtype
    m = x2d.shape[0]
    kp = w.shape[1]
    if k_half % _LANE == 0:
        # Fast path: un-split activation read directly; chunk is an index_map.
        x_arr = x2d.astype(w.dtype)
        out = _fused_pallas_call(x_arr, w, b, shared_x=True, m=m,
                                 out_dtype=out_dtype,
                                 tm_req=tm, tn_req=tn, tk_req=tk)
    else:
        # Ragged feature halves: explicit chunk + zero-pad K (small shapes).
        x_arr = jnp.stack([x2d[:, :k_half], x2d[:, k_half:]]).astype(w.dtype)
        x_arr = jnp.pad(x_arr, ((0, 0), (0, 0), (0, kp - k_half)))
        out = _fused_pallas_call(x_arr, w, b, shared_x=False, m=m,
                                 out_dtype=out_dtype,
                                 tm_req=tm, tn_req=tn, tk_req=tk)
    return out[0, :, :n_half], out[1, :, :n_half]


@functools.partial(jax.jit,
                   static_argnames=("n_half", "k_half", "tm", "tn", "tk"))
def _forward_pair(x_c2, x_p2, w, b, *, n_half, k_half, tm, tn, tk):
    out_dtype = x_c2.dtype
    m = x_c2.shape[0]
    kp = w.shape[1]
    x_arr = jnp.stack([x_c2, x_p2]).astype(w.dtype)            # (2, m, k_half)
    if kp != k_half:
        x_arr = jnp.pad(x_arr, ((0, 0), (0, 0), (0, kp - k_half)))
    out = _fused_pallas_call(x_arr, w, b, shared_x=False, m=m,
                             out_dtype=out_dtype,
                             tm_req=tm, tn_req=tn, tk_req=tk)
    return out[0, :, :n_half], out[1, :, :n_half]


def partitioned_linear(x, params, *, tm=512, tn=512, tk=None):
    """Forward pass of PartitionedLinear.

    Args:
      x: (..., in_features) array, or tuple (x_c, x_p) each (..., in//2).
      params: PartitionedLinearParams from prepare_partitioned_linear_params.
    Returns:
      (out_c, out_p), each (..., out_features // 2), in x's dtype.
    """
    w, b, n_half, k_half = params
    if isinstance(x, (tuple, list)):
        x_c, x_p = x
        if x_c.shape != x_p.shape or x_c.shape[-1] != k_half:
            raise ValueError("x_c / x_p must both be (..., in_features // 2).")
        lead = x_c.shape[:-1]
        out_c, out_p = _forward_pair(
            x_c.reshape(-1, k_half), x_p.reshape(-1, k_half), w, b,
            n_half=n_half, k_half=k_half, tm=tm, tn=tn, tk=tk)
    else:
        if x.shape[-1] != 2 * k_half:
            raise ValueError("x last dim must equal in_features = 2 * (in//2).")
        lead = x.shape[:-1]
        out_c, out_p = _forward_full(
            x.reshape(-1, 2 * k_half), w, b,
            n_half=n_half, k_half=k_half, tm=tm, tn=tn, tk=tk)
    return out_c.reshape(*lead, n_half), out_p.reshape(*lead, n_half)


# ---------------------------------------------------------------------------
# Init + reference (bf16 MXU numerics, f32 accumulation — matches the kernel)
# ---------------------------------------------------------------------------
def init_partitioned_linear_params(key, in_features, out_features,
                                   dtype=jnp.float32):
    in_half, out_half = in_features // 2, out_features // 2
    k = 1.0 / (in_half ** 0.5)
    k_wc, k_bc, k_wp, k_bp = jax.random.split(key, 4)
    w_c = jax.random.uniform(k_wc, (out_half, in_half), dtype, -k, k)
    b_c = jax.random.uniform(k_bc, (out_half,), dtype, -k, k)
    w_p = jax.random.uniform(k_wp, (out_half, in_half), dtype, -k, k)
    b_p = jax.random.uniform(k_bp, (out_half,), dtype, -k, k)
    return w_c, b_c, w_p, b_p


def _reference(x, w_c, b_c, w_p, b_p, compute_dtype=jnp.bfloat16):
    x_c, x_p = jnp.split(x, 2, axis=-1)

    def lin(xh, wh, bh):
        y = jnp.einsum("...i,oi->...o", xh.astype(compute_dtype),
                       wh.astype(compute_dtype),
                       preferred_element_type=jnp.float32)
        return (y + bh.astype(jnp.float32)).astype(x.dtype)

    return lin(x_c, w_c, b_c), lin(x_p, w_p, b_p)


if __name__ == "__main__":
    key = jax.random.PRNGKey(0)
    ks = jax.random.split(key, 4)

    # --- Small shape (ragged K/N fallback, stacked-x path) ------------------
    batch, seq, in_f, out_f = 2, 8, 32, 32
    x = jax.random.normal(ks[0], (batch, seq, in_f), dtype=jnp.float32)
    w_c, b_c, w_p, b_p = init_partitioned_linear_params(ks[1], in_f, out_f)
    params = prepare_partitioned_linear_params(w_c, b_c, w_p, b_p)

    out_c, out_p = partitioned_linear(x, params)
    jax.block_until_ready((out_c, out_p))
    ref_c, ref_p = _reference(x, w_c, b_c, w_p, b_p)
    assert out_c.shape == (batch, seq, out_f // 2)
    assert out_p.shape == (batch, seq, out_f // 2)
    assert jnp.allclose(out_c, ref_c, atol=1e-2, rtol=1e-2)
    assert jnp.allclose(out_p, ref_p, atol=1e-2, rtol=1e-2)

    # Tuple-input branch (PyTorch forward's tuple case).
    x_c_in, x_p_in = jnp.split(x, 2, axis=-1)
    out_c_t, out_p_t = partitioned_linear((x_c_in, x_p_in), params)
    jax.block_until_ready((out_c_t, out_p_t))
    assert jnp.allclose(out_c_t, ref_c, atol=1e-2, rtol=1e-2)
    assert jnp.allclose(out_p_t, ref_p, atol=1e-2, rtol=1e-2)

    # --- Medium shape (zero-copy shared-x fast path, single fused K block) --
    batch2, seq2, in2, out2 = 2, 64, 2048, 256
    x_m = jax.random.normal(ks[2], (batch2, seq2, in2), dtype=jnp.float32)
    w_c2, b_c2, w_p2, b_p2 = init_partitioned_linear_params(ks[3], in2, out2)
    params2 = prepare_partitioned_linear_params(w_c2, b_c2, w_p2, b_p2)

    out_c_m, out_p_m = partitioned_linear(x_m, params2)
    jax.block_until_ready((out_c_m, out_p_m))
    ref_c_m, ref_p_m = _reference(x_m, w_c2, b_c2, w_p2, b_p2)
    assert jnp.allclose(out_c_m, ref_c_m, atol=2e-2, rtol=2e-2)
    assert jnp.allclose(out_p_m, ref_p_m, atol=2e-2, rtol=2e-2)

    # --- Same shape, forced multi-K tiling (exercises accumulator kernel) ---
    out_c_k, out_p_k = partitioned_linear(x_m, params2, tk=512)
    jax.block_until_ready((out_c_k, out_p_k))
    assert jnp.allclose(out_c_k, ref_c_m, atol=2e-2, rtol=2e-2)
    assert jnp.allclose(out_p_k, ref_p_m, atol=2e-2, rtol=2e-2)

    print("KERNEL_OK")
</pallas_src>

<mosaic_0001>
module attributes {stable_mosaic.version = 11 : i64} {
  func.func @_linear_kernel(%arg0: i32, %arg1: i32, %arg2: i32, %arg3: memref<1x16x128xbf16, #tpu.memory_space<vmem>>, %arg4: memref<1x128x128xbf16, #tpu.memory_space<vmem>>, %arg5: memref<1x1x128xf32, #tpu.memory_space<vmem>>, %arg6: memref<1x16x128xf32, #tpu.memory_space<vmem>>) attributes {dimension_semantics = [#tpu.dimension_semantics<parallel>, #tpu.dimension_semantics<parallel>, #tpu.dimension_semantics<parallel>], iteration_bounds = array<i64: 2, 1, 1>, scalar_prefetch = 0 : i64, scratch_operands = 0 : i64, tpu.core_type = #tpu.core_type<tc>, window_params = [{transform_indices = @transform_0, window_bounds = array<i64: 1, 16, 128>}, {transform_indices = @transform_1, window_bounds = array<i64: 1, 128, 128>}, {transform_indices = @transform_2, window_bounds = array<i64: 1, 1, 128>}, {transform_indices = @transform_3, window_bounds = array<i64: 1, 16, 128>}]} {
    %c0 = arith.constant 0 : index
    %c0_0 = arith.constant 0 : index
    %c0_1 = arith.constant 0 : index
    %0 = vector.load %arg3[%c0, %c0_0, %c0_1] : memref<1x16x128xbf16, #tpu.memory_space<vmem>>, vector<1x16x128xbf16>
    %1 = vector.shape_cast %0 : vector<1x16x128xbf16> to vector<16x128xbf16>
    %c0_2 = arith.constant 0 : index
    %c0_3 = arith.constant 0 : index
    %c0_4 = arith.constant 0 : index
    %2 = vector.load %arg4[%c0_2, %c0_3, %c0_4] : memref<1x128x128xbf16, #tpu.memory_space<vmem>>, vector<1x128x128xbf16>
    %3 = vector.shape_cast %2 : vector<1x128x128xbf16> to vector<128x128xbf16>
    %cst = arith.constant dense<0.000000e+00> : vector<16x128xf32>
    %4 = tpu.matmul %1, %3, %cst {dimension_numbers = #tpu.dot_dimension_numbers<[1], [0], [0], [1], [0, 0, 1, 1], [], []>} : vector<16x128xbf16>, vector<128x128xbf16>, vector<16x128xf32> -> vector<16x128xf32>
    %c0_5 = arith.constant 0 : index
    %c0_6 = arith.constant 0 : index
    %c0_7 = arith.constant 0 : index
    %5 = vector.load %arg5[%c0_5, %c0_6, %c0_7] : memref<1x1x128xf32, #tpu.memory_space<vmem>>, vector<1x1x128xf32>
    %6 = vector.shape_cast %5 : vector<1x1x128xf32> to vector<1x128xf32>
    %7 = vector.broadcast %6 : vector<1x128xf32> to vector<16x128xf32>
    %8 = arith.addf %4, %7 : vector<16x128xf32>
    %c0_8 = arith.constant 0 : index
    %c0_9 = arith.constant 0 : index
    %c0_10 = arith.constant 0 : index
    %9 = vector.load %arg6[%c0_8, %c0_9, %c0_10] : memref<1x16x128xf32, #tpu.memory_space<vmem>>, vector<1x16x128xf32>
    %10 = vector.shape_cast %9 : vector<1x16x128xf32> to vector<16x128xf32>
    %11 = vector.shape_cast %8 : vector<16x128xf32> to vector<1x16x128xf32>
    tpu.vector_store %arg6[%c0_8, %c0_9, %c0_10], %11 {strides = array<i32>} : memref<1x16x128xf32, #tpu.memory_space<vmem>>, vector<1x16x128xf32>,
    return
  }
  func.func @transform_0(%arg0: i32, %arg1: i32, %arg2: i32) -> (i32, i32, i32) {
    %c0_i32 = arith.constant 0 : i32
    %c0_i32_0 = arith.constant 0 : i32
    return %arg0, %arg1, %c0_i32 : i32, i32, i32
  }
  func.func @transform_1(%arg0: i32, %arg1: i32, %arg2: i32) -> (i32, i32, i32) {
    %c0_i32 = arith.constant 0 : i32
    %c0_i32_0 = arith.constant 0 : i32
    return %arg0, %c0_i32, %arg2 : i32, i32, i32
  }
  func.func @transform_2(%arg0: i32, %arg1: i32, %arg2: i32) -> (i32, i32, i32) {
    %c0_i32 = arith.constant 0 : i32
    %c0_i32_0 = arith.constant 0 : i32
    return %arg0, %c0_i32, %arg2 : i32, i32, i32
  }
  func.func @transform_3(%arg0: i32, %arg1: i32, %arg2: i32) -> (i32, i32, i32) {
    %c0_i32 = arith.constant 0 : i32
    return %arg0, %arg1, %arg2 : i32, i32, i32
  }
}

</mosaic_0001>

<bundles_post_ra>
// kernel: _forward_full.1
= control target key start
LH: loop header
LB: loop body
LE: loop exit
PB: predicated region body
PF: predicated region fallthrough
CT: control target
= control target key end

     0   :  { %8 = vsyncpa [#allocation3], 0  ;;  %s843_s0 = inlined_call_operand.vmem [shape: bf16[2,16,128], index: 0, kind: input, shape index: {}]   ;;  %s844_s1 = inlined_call_operand.hbm [shape: bf16[2,128,128], index: 1, kind: input, shape index: {}]   ;;  %s845_s2 = inlined_call_operand.vmem [shape: f32[2,1,128], index: 2, kind: input, shape index: {}]   ;;  %s846_s3 = inlined_call_operand.vmem [shape: f32[2,16,128], index: 3, kind: output, shape index: {}]  }
   0x1   :  { %10 = vsyncpa [#allocation3 + $0x1], 0  ;;  %s749_s12 = smov 0   ;;  %s751_s13 = smov 0  }
   0x2   :  { %s753_s14 = smov 0   ;;  %s755_s15 = smov 0  }
   0x3   :  { %s757_s16 = smov 0   ;;  %s759_s17 = smov 0  }
   0x4 LB: > { %s524_s18 = sadd.s32 4294967295, %s725_s17   ;;  %s35_s19 = sadd.s32 1, %s721_s16  ;;  %s725_s17 = sphi %s759_s17, %s16_s17   ;;  %s721_s16 = sphi %s757_s16, %s853_s16   ;;  %s717_s15 = sphi %s755_s15, %s852_s15   ;;  %s713_s14 = sphi %s753_s14, %s851_s14   ;;  %s709_s13 = sphi %s751_s13, %s850_s13   ;;  %s705_s12 = sphi %s749_s12, %s849_s12  }
   0x5   : > { %p37_p0 = scmp.ge.s32.totalorder %s35_s19, 2  ;;  %s72_s20 = sadd.s32 1, %s713_s14 }
   0x6   : > { %p79_p1 = scmp.ne.s32.totalorder %s713_s14, %s709_s13  ;;  %p80_p2 = scmp.eq.s32.totalorder %s725_s17, 0 }
   0x7   : > { %s855_s19 = smov (%p37_p0, %s35_s19), 0  ;;  %p85_p4 = scmp.ne.s32.totalorder %s709_s13, %s705_s12 }
   0x8   : > { %p785_p3 = por %p80_p2, %p79_p1  ;;  %s67_s22 = ssub.s32 %s721_s16, %s855_s19 }
   0x9   : > { %p86_p5 = scmp.eq.s32.totalorder %s524_s18, 0  ;;  %p70_p6 = scmp.eq.s32.totalorder %s67_s22, 0 }
   0xa   : > { %p593_p8 = scmp.lt.s32.totalorder %s725_s17, 2  ;;  %s180_s25 = sand.u32 1, %s713_s14  }
   0xb   : > { %p792_p7 = por %p86_p5, %p85_p4  ;;  %s575_s26 = sshll.u32 %s721_s16, 6 }
   0xc   : > { %s798_s24 = scalar_select %p70_p6, %s713_s14, %s72_s20  }
   0xd   : > { %s528_s27 = sshll.u32 %s180_s25, 6  ;;  %s190_s30 = scalar_lea.hbm %s844_s1, %s575_s26 }
   0xe   : > { %s191_s4 = sshll.u32 %s190_s30, 4  ;;  %s184_s5 = scalar_lea.vmem [#allocation2], %s528_s27  ;;  %s192_s4 = int_to_ptr.hbm [resolvable:$true] %s191_s4 }
   0xf   : > { %s193_s6 = sshll.u32 %s184_s5, 4  ;;  %p590_p9 = pnand %p593_p8, %p785_p3  ;;  %s194_s6 = int_to_ptr.vmem [resolvable:$true] %s193_s6 }
  0x10   : > { %p531_p10 = scmp.ge.s32.totalorder %s725_s17, 1  ;;  %p210_p11 = scmp.lt.s32.totalorder %s725_s17, 3 }
  0x11   : > { %s181_s7 = scalar_lea.sflag [#allocation3], %s180_s25  ;;  %s727_s8 = smov 64  }
  0x12   : > { %s728_s9 = smov 4   ;;  %p211_p12 = pnand %p531_p10, %p210_p11 }
  0x13   : > { %592 = dma.hbm_to_vmem [thread:$0]  (!%p590_p9), %s192_s4, 1024, %s194_s6, %s181_s7, %s727_s8, %s727_s8, %s728_s9  }
  0x14   : > { %214 = sbr.rel (%p211_p12) target bundleno = 195 (0xc3), region = 32  ;;  %s216_s10 = sand.u32 (!%p211_p12), 1, %s709_s13  }
  0x15   : > { %s532_s11 = sshll.u32 (!%p211_p12), %s216_s10, 6  ;;  %s217_s12 = scalar_lea.sflag (!%p211_p12), [#allocation3], %s216_s10 }
  0x16   : > { %s220_s18 = scalar_lea.vmem (!%p211_p12), [#allocation2], %s532_s11 }
  0x19   : > { %700 = dma.done.wait (%p792_p7), %s217_s12, 1024  }
  0x1a   : > { %702 = vsyncadd (%p792_p7), %s217_s12, 4294966272  ;;  %p267_p13 = scmp.lt.s32.totalorder %s717_s15, 1  ;;  %v586_v0 = vld [vmem:[%s220_s18 + $0x38] sm:$0xff]  ;;  %v585_v1 = vld [vmem:[%s220_s18 + $0x30] sm:$0xff] }
  0x1b   : > { %371 = vmatpush.bf16.msra.mxu0 %v586_v0  ;;  %v584_v2 = vld [vmem:[%s220_s18 + $0x28] sm:$0xff]  ;;  %v583_v3 = vld [vmem:[%s220_s18 + $0x20] sm:$0xff]  ;;  %v582_v4 = vld [vmem:[%s220_s18 + $0x18] sm:$0xff] }
  0x1c   : > { %s857_s15 = smov (!%p267_p13, %s717_s15), 1  ;;  %v581_v5 = vld [vmem:[%s220_s18 + $0x10] sm:$0xff]  ;;  %v580_v6 = vld [vmem:[%s220_s18 + $0x8] sm:$0xff]  ;;  %v579_v7 = vld [vmem:[%s220_s18] sm:$0xff] }
  0x1d   : > { %s281_s22 = scalar_lea.vmem %s845_s2, %s857_s15  ;;  %s576_s23 = sshll.u32 %s857_s15, 3 }
  0x1e   : > { %s274_s27 = scalar_lea.vmem %s843_s0, %s576_s23  ;;  %s577_s28 = sshll.u32 %s857_s15, 4  ;;  %v644_v9 = vld [vmem:[%s281_s22] ss:$0 sm:$0xff] }
  0x1f   : > { %372 = vmatpush.bf16.msra.mxu0 %v585_v1  ;;  %v578_v8 = vld [vmem:[%s274_s27] sm:$0xff]  ;;  %s293_s4 = scalar_lea.vmem %s846_s3, %s577_s28 }
  0x23   : > { %373 = vmatpush.bf16.msra.mxu0 %v584_v2 }
  0x27   : > { %374 = vmatpush.bf16.msra.mxu0 %v583_v3 }
  0x2b   : > { %375 = vmatpush.bf16.msra.mxu0 %v582_v4 }
  0x2f   : > { %376 = vmatpush.bf16.msra.mxu0 %v581_v5 }
  0x33   : > { %377 = vmatpush.bf16.msra.mxu0 %v580_v6 }
  0x37   : > { %378 = vmatpush.bf16.msra.mxu0 %v579_v7 }
  0x3a   : > { %379 = vmatmul.bf16.vlgmr.msra.gmra.mxu0 %v578_v8 }
  0xb7   : > { %v380_v10 = vpop.f32.mrf.mxu0 }
  0xb8   : > { %v381_v11 = vadd.f32 %v644_v9, %v380_v10 }
  0xba   : > { %385 = vst [vmem:[%s293_s4] sm:$0xff] %v381_v11 }
  0xbf   : > { %v382_v12 = vpop.f32.mrf.mxu0 }
  0xc0   : > { %v383_v13 = vadd.f32 %v644_v9, %v382_v12 }
  0xc2   : > { %386 = vst [vmem:[%s293_s4 + $0x8] sm:$0xff] %v383_v13 }
  0xc3 PF: > { %s16_s17 = sadd.s32 1, %s725_s17   ;;  %s849_s12 = smov %s709_s13 }
  0xc4   : > { %p13_p0 = scmp.ge.s32.totalorder %s16_s17, 4   ;;  %s850_s13 = smov %s713_s14 }
  0xc5   : > { %s851_s14 = smov %s798_s24  ;;  %s852_s15 = smov %s721_s16 }
  0xc6   : > { %s853_s16 = smov %s855_s19  ;;  %15 = sbr.rel (!%p13_p0) target bundleno = 4 (0x4), region = 78 }
  0xcb   :  { %423 = vsyncpa [#allocation3], 1 }
  0xcc   :  { %425 = vsyncpa [#allocation3 + $0x1], 1 }

</bundles_post_ra>
